<compile_context>
chip_gen: v6e
topology: v6e:2x2x1
jax: 0.10.0
libtpu: 0.0.40
codegen_flags: <defaults>
</compile_context>

<pallas_src>
import functools

import jax
import jax.numpy as jnp
from jax import lax
from jax.experimental import pallas as pl
from jax.experimental.pallas import tpu as pltpu


def _conv_bn_relu_kernel(x_ref, w_ref, b_ref, o_ref, *, kh, kw, stride,
                         h_out, w_out, b_phase):
    """Fused conv (kh*kw shifted-tap matmuls) + folded-BN bias + ReLU.

    x_ref: (1, stride*stride, Cin, A*B)  bf16  padded / phase-split image
    w_ref: (kh*kw, Cout, Cin)            bf16  BN-scale-folded conv weights
    b_ref: (Cout, 1)                     f32   folded conv-bias + BN shift
    o_ref: (1, Cout, Ho*Wo)              f32
    """
    l_acc = (h_out - 1) * b_phase + w_out      # flat window length per tap
    acc = None
    for ih in range(kh):
        for iw in range(kw):
            ph = (ih % stride) * stride + (iw % stride)
            off = (ih // stride) * b_phase + (iw // stride)
            x_tap = x_ref[0, ph, :, off:off + l_acc]           # (Cin, l_acc) bf16
            w_tap = w_ref[ih * kw + iw]                        # (Cout, Cin)  bf16
            part = jnp.dot(w_tap, x_tap,
                           preferred_element_type=jnp.float32)
            acc = part if acc is None else acc + part
    y = jnp.maximum(acc + b_ref[...], 0.0).astype(o_ref.dtype)  # (Cout, l_acc)
    # Compact the valid columns (wo < Wo of each output row) into the
    # lane-dense (Cout, Ho*Wo) output block -- VMEM-local, no post-kernel pass.
    for ho in range(h_out):
        o_ref[0, :, ho * w_out:(ho + 1) * w_out] = (
            y[:, ho * b_phase:ho * b_phase + w_out])


def basic_block(x_nchw, w_oihw, conv_bias, gamma, beta, run_mean, run_var,
                *, stride=1, eps=1e-5):
    """Pallas implementation of BasicBlock.forward (eval-mode BN). NCHW f32 in/out."""
    n, cin, h, w = x_nchw.shape
    cout, _, kh, kw = w_oihw.shape
    pad = 1  # BasicBlock: kernel_size=3, padding=1
    h_out = (h + 2 * pad - kh) // stride + 1
    w_out = (w + 2 * pad - kw) // stride + 1
    a_rows = h_out + (kh - 1) // stride     # per-phase padded rows needed
    b_cols = w_out + (kw - 1) // stride     # per-phase padded cols needed
    n_ph = stride * stride

    # ---- wrapper-side glue: one ~1x pass over the input (pad + phase + bf16) ----
    pad_h_hi = max(h + 2 * pad, a_rows * stride) - h - pad
    pad_w_hi = max(w + 2 * pad, b_cols * stride) - w - pad
    x_pad = jnp.pad(x_nchw.astype(jnp.float32),
                    ((0, 0), (0, 0), (pad, pad_h_hi), (pad, pad_w_hi)))
    phases = []
    for ph in range(stride):
        for pw in range(stride):
            phases.append(
                x_pad[:, :,
                      ph:ph + (a_rows - 1) * stride + 1:stride,
                      pw:pw + (b_cols - 1) * stride + 1:stride])
    x_ph = jnp.stack(phases, axis=1)                        # (N, s*s, Cin, A, B)
    x_ph = x_ph.reshape(n, n_ph, cin, a_rows * b_cols).astype(jnp.bfloat16)

    # Fold BatchNorm (eval, running stats) + conv bias into weights / bias.
    scale = (gamma / jnp.sqrt(run_var + eps)).astype(jnp.float32)      # (Cout,)
    w_taps = jnp.transpose(w_oihw, (2, 3, 0, 1)).reshape(kh * kw, cout, cin)
    w_taps = (w_taps * scale[None, :, None]).astype(jnp.bfloat16)      # (T,Cout,Cin)
    bias = ((conv_bias - run_mean) * scale + beta).astype(jnp.float32)
    bias = bias.reshape(cout, 1)                                       # (Cout, 1)

    kernel = functools.partial(
        _conv_bn_relu_kernel, kh=kh, kw=kw, stride=stride,
        h_out=h_out, w_out=w_out, b_phase=b_cols)

    out = pl.pallas_call(
        kernel,
        out_shape=jax.ShapeDtypeStruct((n, cout, h_out * w_out), jnp.float32),
        grid_spec=pl.GridSpec(
            grid=(n,),
            in_specs=[
                pl.BlockSpec((1, n_ph, cin, a_rows * b_cols),
                             lambda i: (i, 0, 0, 0)),                  # image
                pl.BlockSpec((kh * kw, cout, cin), lambda i: (0, 0, 0)),  # weights
                pl.BlockSpec((cout, 1), lambda i: (0, 0)),                # bias
            ],
            out_specs=pl.BlockSpec((1, cout, h_out * w_out),
                                   lambda i: (i, 0, 0)),
        ),
        compiler_params=pltpu.CompilerParams(
            dimension_semantics=("parallel",)),
    )(x_ph, w_taps, bias)

    # Free contiguous reshape to NCHW (no transpose / extra HBM pass).
    return out.reshape(n, cout, h_out, w_out)


def _reference(x_nchw, w_oihw, conv_bias, gamma, beta, run_mean, run_var,
               *, stride=1, eps=1e-5):
    y = lax.conv_general_dilated(
        x_nchw, w_oihw, window_strides=(stride, stride),
        padding=((1, 1), (1, 1)),
        dimension_numbers=("NCHW", "OIHW", "NCHW"))
    y = y + conv_bias[None, :, None, None]
    y = (y - run_mean[None, :, None, None]) / jnp.sqrt(
        run_var[None, :, None, None] + eps)
    y = y * gamma[None, :, None, None] + beta[None, :, None, None]
    return jnp.maximum(y, 0.0)


if __name__ == "__main__":
    # Small shapes consistent with the module: N=2, Cin=4, Cout=8, H=W=16, stride=1
    key = jax.random.PRNGKey(0)
    k_x, k_w, k_b, k_g, k_be, k_m, k_v = jax.random.split(key, 7)

    N, CIN, COUT, H, W, STRIDE = 2, 4, 8, 16, 16, 1

    x = jax.random.normal(k_x, (N, CIN, H, W), jnp.float32)
    w = jax.random.normal(k_w, (COUT, CIN, 3, 3), jnp.float32) * 0.1
    conv_bias = jax.random.normal(k_b, (COUT,), jnp.float32) * 0.1
    gamma = 1.0 + 0.1 * jax.random.normal(k_g, (COUT,), jnp.float32)
    beta = 0.1 * jax.random.normal(k_be, (COUT,), jnp.float32)
    run_mean = 0.1 * jax.random.normal(k_m, (COUT,), jnp.float32)
    run_var = jnp.abs(jax.random.normal(k_v, (COUT,), jnp.float32)) + 0.5

    fwd = jax.jit(functools.partial(basic_block, stride=STRIDE))
    out = jax.block_until_ready(
        fwd(x, w, conv_bias, gamma, beta, run_mean, run_var))

    ref = _reference(x, w, conv_bias, gamma, beta, run_mean, run_var,
                     stride=STRIDE)
    assert out.shape == (N, COUT, H // STRIDE, W // STRIDE)
    # bf16 GEMM operands (f32 accumulation): tolerance loosened vs the f32 ref.
    assert jnp.allclose(out, ref, rtol=5e-2, atol=5e-2), "mismatch vs reference"

    print("KERNEL_OK")
</pallas_src>

<mosaic_0001>
module attributes {stable_mosaic.version = 11 : i64} {
  func.func @_conv_bn_relu_kernel(%arg0: i32, %arg1: memref<1x1x4x324xbf16, #tpu.memory_space<vmem>>, %arg2: memref<9x8x4xbf16, #tpu.memory_space<vmem>>, %arg3: memref<8x1xf32, #tpu.memory_space<vmem>>, %arg4: memref<1x8x256xf32, #tpu.memory_space<vmem>>) attributes {dimension_semantics = [#tpu.dimension_semantics<parallel>], iteration_bounds = array<i64: 2>, scalar_prefetch = 0 : i64, scratch_operands = 0 : i64, tpu.core_type = #tpu.core_type<tc>, window_params = [{transform_indices = @transform_0, window_bounds = array<i64: 1, 1, 4, 324>}, {pipeline_mode = #tpu.pipeline_mode<synchronous>, transform_indices = @transform_1, window_bounds = array<i64: 9, 8, 4>}, {pipeline_mode = #tpu.pipeline_mode<synchronous>, transform_indices = @transform_2, window_bounds = array<i64: 8, 1>}, {transform_indices = @transform_3, window_bounds = array<i64: 1, 8, 256>}]} {
    %c0 = arith.constant 0 : index
    %c0_0 = arith.constant 0 : index
    %c0_1 = arith.constant 0 : index
    %c0_2 = arith.constant 0 : index
    %0 = vector.load %arg1[%c0, %c0_0, %c0_1, %c0_2] : memref<1x1x4x324xbf16, #tpu.memory_space<vmem>>, vector<1x1x4x286xbf16>
    %1 = vector.shape_cast %0 : vector<1x1x4x286xbf16> to vector<4x286xbf16>
    %c0_3 = arith.constant 0 : index
    %c0_4 = arith.constant 0 : index
    %c0_5 = arith.constant 0 : index
    %2 = vector.load %arg2[%c0_3, %c0_4, %c0_5] : memref<9x8x4xbf16, #tpu.memory_space<vmem>>, vector<1x8x4xbf16>
    %3 = vector.shape_cast %2 : vector<1x8x4xbf16> to vector<8x4xbf16>
    %cst = arith.constant dense<0.000000e+00> : vector<8x286xf32>
    %4 = tpu.matmul %3, %1, %cst {dimension_numbers = #tpu.dot_dimension_numbers<[1], [0], [0], [1], [0, 0, 1, 1], [], []>} : vector<8x4xbf16>, vector<4x286xbf16>, vector<8x286xf32> -> vector<8x286xf32>
    %c0_6 = arith.constant 0 : index
    %c0_7 = arith.constant 0 : index
    %c0_8 = arith.constant 0 : index
    %c1 = arith.constant 1 : index
    %5 = vector.load %arg1[%c0_6, %c0_7, %c0_8, %c1] : memref<1x1x4x324xbf16, #tpu.memory_space<vmem>>, vector<1x1x4x286xbf16>
    %6 = vector.shape_cast %5 : vector<1x1x4x286xbf16> to vector<4x286xbf16>
    %c1_9 = arith.constant 1 : index
    %c0_10 = arith.constant 0 : index
    %c0_11 = arith.constant 0 : index
    %7 = vector.load %arg2[%c1_9, %c0_10, %c0_11] : memref<9x8x4xbf16, #tpu.memory_space<vmem>>, vector<1x8x4xbf16>
    %8 = vector.shape_cast %7 : vector<1x8x4xbf16> to vector<8x4xbf16>
    %cst_12 = arith.constant dense<0.000000e+00> : vector<8x286xf32>
    %9 = tpu.matmul %8, %6, %cst_12 {dimension_numbers = #tpu.dot_dimension_numbers<[1], [0], [0], [1], [0, 0, 1, 1], [], []>} : vector<8x4xbf16>, vector<4x286xbf16>, vector<8x286xf32> -> vector<8x286xf32>
    %10 = arith.addf %4, %9 : vector<8x286xf32>
    %c0_13 = arith.constant 0 : index
    %c0_14 = arith.constant 0 : index
    %c0_15 = arith.constant 0 : index
    %c2 = arith.constant 2 : index
    %11 = vector.load %arg1[%c0_13, %c0_14, %c0_15, %c2] : memref<1x1x4x324xbf16, #tpu.memory_space<vmem>>, vector<1x1x4x286xbf16>
    %12 = vector.shape_cast %11 : vector<1x1x4x286xbf16> to vector<4x286xbf16>
    %c2_16 = arith.constant 2 : index
    %c0_17 = arith.constant 0 : index
    %c0_18 = arith.constant 0 : index
    %13 = vector.load %arg2[%c2_16, %c0_17, %c0_18] : memref<9x8x4xbf16, #tpu.memory_space<vmem>>, vector<1x8x4xbf16>
    %14 = vector.shape_cast %13 : vector<1x8x4xbf16> to vector<8x4xbf16>
    %cst_19 = arith.constant dense<0.000000e+00> : vector<8x286xf32>
    %15 = tpu.matmul %14, %12, %cst_19 {dimension_numbers = #tpu.dot_dimension_numbers<[1], [0], [0], [1], [0, 0, 1, 1], [], []>} : vector<8x4xbf16>, vector<4x286xbf16>, vector<8x286xf32> -> vector<8x286xf32>
    %16 = arith.addf %10, %15 : vector<8x286xf32>
    %c0_20 = arith.constant 0 : index
    %c0_21 = arith.constant 0 : index
    %c0_22 = arith.constant 0 : index
    %c18 = arith.constant 18 : index
    %17 = vector.load %arg1[%c0_20, %c0_21, %c0_22, %c18] : memref<1x1x4x324xbf16, #tpu.memory_space<vmem>>, vector<1x1x4x286xbf16>
    %18 = vector.shape_cast %17 : vector<1x1x4x286xbf16> to vector<4x286xbf16>
    %c3 = arith.constant 3 : index
    %c0_23 = arith.constant 0 : index
    %c0_24 = arith.constant 0 : index
    %19 = vector.load %arg2[%c3, %c0_23, %c0_24] : memref<9x8x4xbf16, #tpu.memory_space<vmem>>, vector<1x8x4xbf16>
    %20 = vector.shape_cast %19 : vector<1x8x4xbf16> to vector<8x4xbf16>
    %cst_25 = arith.constant dense<0.000000e+00> : vector<8x286xf32>
    %21 = tpu.matmul %20, %18, %cst_25 {dimension_numbers = #tpu.dot_dimension_numbers<[1], [0], [0], [1], [0, 0, 1, 1], [], []>} : vector<8x4xbf16>, vector<4x286xbf16>, vector<8x286xf32> -> vector<8x286xf32>
    %22 = arith.addf %16, %21 : vector<8x286xf32>
    %c0_26 = arith.constant 0 : index
    %c0_27 = arith.constant 0 : index
    %c0_28 = arith.constant 0 : index
    %c19 = arith.constant 19 : index
    %23 = vector.load %arg1[%c0_26, %c0_27, %c0_28, %c19] : memref<1x1x4x324xbf16, #tpu.memory_space<vmem>>, vector<1x1x4x286xbf16>
    %24 = vector.shape_cast %23 : vector<1x1x4x286xbf16> to vector<4x286xbf16>
    %c4 = arith.constant 4 : index
    %c0_29 = arith.constant 0 : index
    %c0_30 = arith.constant 0 : index
    %25 = vector.load %arg2[%c4, %c0_29, %c0_30] : memref<9x8x4xbf16, #tpu.memory_space<vmem>>, vector<1x8x4xbf16>
    %26 = vector.shape_cast %25 : vector<1x8x4xbf16> to vector<8x4xbf16>
    %cst_31 = arith.constant dense<0.000000e+00> : vector<8x286xf32>
    %27 = tpu.matmul %26, %24, %cst_31 {dimension_numbers = #tpu.dot_dimension_numbers<[1], [0], [0], [1], [0, 0, 1, 1], [], []>} : vector<8x4xbf16>, vector<4x286xbf16>, vector<8x286xf32> -> vector<8x286xf32>
    %28 = arith.addf %22, %27 : vector<8x286xf32>
    %c0_32 = arith.constant 0 : index
    %c0_33 = arith.constant 0 : index
    %c0_34 = arith.constant 0 : index
    %c20 = arith.constant 20 : index
    %29 = vector.load %arg1[%c0_32, %c0_33, %c0_34, %c20] : memref<1x1x4x324xbf16, #tpu.memory_space<vmem>>, vector<1x1x4x286xbf16>
    %30 = vector.shape_cast %29 : vector<1x1x4x286xbf16> to vector<4x286xbf16>
    %c5 = arith.constant 5 : index
    %c0_35 = arith.constant 0 : index
    %c0_36 = arith.constant 0 : index
    %31 = vector.load %arg2[%c5, %c0_35, %c0_36] : memref<9x8x4xbf16, #tpu.memory_space<vmem>>, vector<1x8x4xbf16>
    %32 = vector.shape_cast %31 : vector<1x8x4xbf16> to vector<8x4xbf16>
    %cst_37 = arith.constant dense<0.000000e+00> : vector<8x286xf32>
    %33 = tpu.matmul %32, %30, %cst_37 {dimension_numbers = #tpu.dot_dimension_numbers<[1], [0], [0], [1], [0, 0, 1, 1], [], []>} : vector<8x4xbf16>, vector<4x286xbf16>, vector<8x286xf32> -> vector<8x286xf32>
    %34 = arith.addf %28, %33 : vector<8x286xf32>
    %c0_38 = arith.constant 0 : index
    %c0_39 = arith.constant 0 : index
    %c0_40 = arith.constant 0 : index
    %c36 = arith.constant 36 : index
    %35 = vector.load %arg1[%c0_38, %c0_39, %c0_40, %c36] : memref<1x1x4x324xbf16, #tpu.memory_space<vmem>>, vector<1x1x4x286xbf16>
    %36 = vector.shape_cast %35 : vector<1x1x4x286xbf16> to vector<4x286xbf16>
    %c6 = arith.constant 6 : index
    %c0_41 = arith.constant 0 : index
    %c0_42 = arith.constant 0 : index
    %37 = vector.load %arg2[%c6, %c0_41, %c0_42] : memref<9x8x4xbf16, #tpu.memory_space<vmem>>, vector<1x8x4xbf16>
    %38 = vector.shape_cast %37 : vector<1x8x4xbf16> to vector<8x4xbf16>
    %cst_43 = arith.constant dense<0.000000e+00> : vector<8x286xf32>
    %39 = tpu.matmul %38, %36, %cst_43 {dimension_numbers = #tpu.dot_dimension_numbers<[1], [0], [0], [1], [0, 0, 1, 1], [], []>} : vector<8x4xbf16>, vector<4x286xbf16>, vector<8x286xf32> -> vector<8x286xf32>
    %40 = arith.addf %34, %39 : vector<8x286xf32>
    %c0_44 = arith.constant 0 : index
    %c0_45 = arith.constant 0 : index
    %c0_46 = arith.constant 0 : index
    %c37 = arith.constant 37 : index
    %41 = vector.load %arg1[%c0_44, %c0_45, %c0_46, %c37] : memref<1x1x4x324xbf16, #tpu.memory_space<vmem>>, vector<1x1x4x286xbf16>
    %42 = vector.shape_cast %41 : vector<1x1x4x286xbf16> to vector<4x286xbf16>
    %c7 = arith.constant 7 : index
    %c0_47 = arith.constant 0 : index
    %c0_48 = arith.constant 0 : index
    %43 = vector.load %arg2[%c7, %c0_47, %c0_48] : memref<9x8x4xbf16, #tpu.memory_space<vmem>>, vector<1x8x4xbf16>
    %44 = vector.shape_cast %43 : vector<1x8x4xbf16> to vector<8x4xbf16>
    %cst_49 = arith.constant dense<0.000000e+00> : vector<8x286xf32>
    %45 = tpu.matmul %44, %42, %cst_49 {dimension_numbers = #tpu.dot_dimension_numbers<[1], [0], [0], [1], [0, 0, 1, 1], [], []>} : vector<8x4xbf16>, vector<4x286xbf16>, vector<8x286xf32> -> vector<8x286xf32>
    %46 = arith.addf %40, %45 : vector<8x286xf32>
    %c0_50 = arith.constant 0 : index
    %c0_51 = arith.constant 0 : index
    %c0_52 = arith.constant 0 : index
    %c38 = arith.constant 38 : index
    %47 = vector.load %arg1[%c0_50, %c0_51, %c0_52, %c38] : memref<1x1x4x324xbf16, #tpu.memory_space<vmem>>, vector<1x1x4x286xbf16>
    %48 = vector.shape_cast %47 : vector<1x1x4x286xbf16> to vector<4x286xbf16>
    %c8 = arith.constant 8 : index
    %c0_53 = arith.constant 0 : index
    %c0_54 = arith.constant 0 : index
    %49 = vector.load %arg2[%c8, %c0_53, %c0_54] : memref<9x8x4xbf16, #tpu.memory_space<vmem>>, vector<1x8x4xbf16>
    %50 = vector.shape_cast %49 : vector<1x8x4xbf16> to vector<8x4xbf16>
    %cst_55 = arith.constant dense<0.000000e+00> : vector<8x286xf32>
    %51 = tpu.matmul %50, %48, %cst_55 {dimension_numbers = #tpu.dot_dimension_numbers<[1], [0], [0], [1], [0, 0, 1, 1], [], []>} : vector<8x4xbf16>, vector<4x286xbf16>, vector<8x286xf32> -> vector<8x286xf32>
    %52 = arith.addf %46, %51 : vector<8x286xf32>
    %c0_56 = arith.constant 0 : index
    %c0_57 = arith.constant 0 : index
    %53 = vector.load %arg3[%c0_56, %c0_57] : memref<8x1xf32, #tpu.memory_space<vmem>>, vector<8x1xf32>
    %54 = vector.broadcast %53 : vector<8x1xf32> to vector<8x286xf32>
    %55 = arith.addf %52, %54 : vector<8x286xf32>
    %cst_58 = arith.constant 0.000000e+00 : f32
    %56 = vector.broadcast %cst_58 : f32 to vector<8x286xf32>
    %57 = arith.maximumf %55, %56 : vector<8x286xf32>
    %58 = vector.extract_strided_slice %57 {offsets = [0, 0], sizes = [8, 16], strides = [1, 1]} : vector<8x286xf32> to vector<8x16xf32>
    %c0_59 = arith.constant 0 : index
    %c0_60 = arith.constant 0 : index
    %c0_61 = arith.constant 0 : index
    %59 = vector.load %arg4[%c0_59, %c0_60, %c0_61] : memref<1x8x256xf32, #tpu.memory_space<vmem>>, vector<1x8x16xf32>
    %60 = vector.shape_cast %59 : vector<1x8x16xf32> to vector<8x16xf32>
    %61 = vector.shape_cast %58 : vector<8x16xf32> to vector<1x8x16xf32>
    tpu.vector_store %arg4[%c0_59, %c0_60, %c0_61], %61 {strides = array<i32>} : memref<1x8x256xf32, #tpu.memory_space<vmem>>, vector<1x8x16xf32>,
    %62 = vector.extract_strided_slice %57 {offsets = [0, 18], sizes = [8, 16], strides = [1, 1]} : vector<8x286xf32> to vector<8x16xf32>
    %c0_62 = arith.constant 0 : index
    %c0_63 = arith.constant 0 : index
    %c16 = arith.constant 16 : index
    %63 = vector.load %arg4[%c0_62, %c0_63, %c16] : memref<1x8x256xf32, #tpu.memory_space<vmem>>, vector<1x8x16xf32>
    %64 = vector.shape_cast %63 : vector<1x8x16xf32> to vector<8x16xf32>
    %65 = vector.shape_cast %62 : vector<8x16xf32> to vector<1x8x16xf32>
    tpu.vector_store %arg4[%c0_62, %c0_63, %c16], %65 {strides = array<i32>} : memref<1x8x256xf32, #tpu.memory_space<vmem>>, vector<1x8x16xf32>,
    %66 = vector.extract_strided_slice %57 {offsets = [0, 36], sizes = [8, 16], strides = [1, 1]} : vector<8x286xf32> to vector<8x16xf32>
    %c0_64 = arith.constant 0 : index
    %c0_65 = arith.constant 0 : index
    %c32 = arith.constant 32 : index
    %67 = vector.load %arg4[%c0_64, %c0_65, %c32] : memref<1x8x256xf32, #tpu.memory_space<vmem>>, vector<1x8x16xf32>
    %68 = vector.shape_cast %67 : vector<1x8x16xf32> to vector<8x16xf32>
    %69 = vector.shape_cast %66 : vector<8x16xf32> to vector<1x8x16xf32>
    tpu.vector_store %arg4[%c0_64, %c0_65, %c32], %69 {strides = array<i32>} : memref<1x8x256xf32, #tpu.memory_space<vmem>>, vector<1x8x16xf32>,
    %70 = vector.extract_strided_slice %57 {offsets = [0, 54], sizes = [8, 16], strides = [1, 1]} : vector<8x286xf32> to vector<8x16xf32>
    %c0_66 = arith.constant 0 : index
    %c0_67 = arith.constant 0 : index
    %c48 = arith.constant 48 : index
    %71 = vector.load %arg4[%c0_66, %c0_67, %c48] : memref<1x8x256xf32, #tpu.memory_space<vmem>>, vector<1x8x16xf32>
    %72 = vector.shape_cast %71 : vector<1x8x16xf32> to vector<8x16xf32>
    %73 = vector.shape_cast %70 : vector<8x16xf32> to vector<1x8x16xf32>
    tpu.vector_store %arg4[%c0_66, %c0_67, %c48], %73 {strides = array<i32>} : memref<1x8x256xf32, #tpu.memory_space<vmem>>, vector<1x8x16xf32>,
    %74 = vector.extract_strided_slice %57 {offsets = [0, 72], sizes = [8, 16], strides = [1, 1]} : vector<8x286xf32> to vector<8x16xf32>
    %c0_68 = arith.constant 0 : index
    %c0_69 = arith.constant 0 : index
    %c64 = arith.constant 64 : index
    %75 = vector.load %arg4[%c0_68, %c0_69, %c64] : memref<1x8x256xf32, #tpu.memory_space<vmem>>, vector<1x8x16xf32>
    %76 = vector.shape_cast %75 : vector<1x8x16xf32> to vector<8x16xf32>
    %77 = vector.shape_cast %74 : vector<8x16xf32> to vector<1x8x16xf32>
    tpu.vector_store %arg4[%c0_68, %c0_69, %c64], %77 {strides = array<i32>} : memref<1x8x256xf32, #tpu.memory_space<vmem>>, vector<1x8x16xf32>,
    %78 = vector.extract_strided_slice %57 {offsets = [0, 90], sizes = [8, 16], strides = [1, 1]} : vector<8x286xf32> to vector<8x16xf32>
    %c0_70 = arith.constant 0 : index
    %c0_71 = arith.constant 0 : index
    %c80 = arith.constant 80 : index
    %79 = vector.load %arg4[%c0_70, %c0_71, %c80] : memref<1x8x256xf32, #tpu.memory_space<vmem>>, vector<1x8x16xf32>
    %80 = vector.shape_cast %79 : vector<1x8x16xf32> to vector<8x16xf32>
    %81 = vector.shape_cast %78 : vector<8x16xf32> to vector<1x8x16xf32>
    tpu.vector_store %arg4[%c0_70, %c0_71, %c80], %81 {strides = array<i32>} : memref<1x8x256xf32, #tpu.memory_space<vmem>>, vector<1x8x16xf32>,
    %82 = vector.extract_strided_slice %57 {offsets = [0, 108], sizes = [8, 16], strides = [1, 1]} : vector<8x286xf32> to vector<8x16xf32>
    %c0_72 = arith.constant 0 : index
    %c0_73 = arith.constant 0 : index
    %c96 = arith.constant 96 : index
    %83 = vector.load %arg4[%c0_72, %c0_73, %c96] : memref<1x8x256xf32, #tpu.memory_space<vmem>>, vector<1x8x16xf32>
    %84 = vector.shape_cast %83 : vector<1x8x16xf32> to vector<8x16xf32>
    %85 = vector.shape_cast %82 : vector<8x16xf32> to vector<1x8x16xf32>
    tpu.vector_store %arg4[%c0_72, %c0_73, %c96], %85 {strides = array<i32>} : memref<1x8x256xf32, #tpu.memory_space<vmem>>, vector<1x8x16xf32>,
    %86 = vector.extract_strided_slice %57 {offsets = [0, 126], sizes = [8, 16], strides = [1, 1]} : vector<8x286xf32> to vector<8x16xf32>
    %c0_74 = arith.constant 0 : index
    %c0_75 = arith.constant 0 : index
    %c112 = arith.constant 112 : index
    %87 = vector.load %arg4[%c0_74, %c0_75, %c112] : memref<1x8x256xf32, #tpu.memory_space<vmem>>, vector<1x8x16xf32>
    %88 = vector.shape_cast %87 : vector<1x8x16xf32> to vector<8x16xf32>
    %89 = vector.shape_cast %86 : vector<8x16xf32> to vector<1x8x16xf32>
    tpu.vector_store %arg4[%c0_74, %c0_75, %c112], %89 {strides = array<i32>} : memref<1x8x256xf32, #tpu.memory_space<vmem>>, vector<1x8x16xf32>,
    %90 = vector.extract_strided_slice %57 {offsets = [0, 144], sizes = [8, 16], strides = [1, 1]} : vector<8x286xf32> to vector<8x16xf32>
    %c0_76 = arith.constant 0 : index
    %c0_77 = arith.constant 0 : index
    %c128 = arith.constant 128 : index
    %91 = vector.load %arg4[%c0_76, %c0_77, %c128] : memref<1x8x256xf32, #tpu.memory_space<vmem>>, vector<1x8x16xf32>
    %92 = vector.shape_cast %91 : vector<1x8x16xf32> to vector<8x16xf32>
    %93 = vector.shape_cast %90 : vector<8x16xf32> to vector<1x8x16xf32>
    tpu.vector_store %arg4[%c0_76, %c0_77, %c128], %93 {strides = array<i32>} : memref<1x8x256xf32, #tpu.memory_space<vmem>>, vector<1x8x16xf32>,
    %94 = vector.extract_strided_slice %57 {offsets = [0, 162], sizes = [8, 16], strides = [1, 1]} : vector<8x286xf32> to vector<8x16xf32>
    %c0_78 = arith.constant 0 : index
    %c0_79 = arith.constant 0 : index
    %c144 = arith.constant 144 : index
    %95 = vector.load %arg4[%c0_78, %c0_79, %c144] : memref<1x8x256xf32, #tpu.memory_space<vmem>>, vector<1x8x16xf32>
    %96 = vector.shape_cast %95 : vector<1x8x16xf32> to vector<8x16xf32>
    %97 = vector.shape_cast %94 : vector<8x16xf32> to vector<1x8x16xf32>
    tpu.vector_store %arg4[%c0_78, %c0_79, %c144], %97 {strides = array<i32>} : memref<1x8x256xf32, #tpu.memory_space<vmem>>, vector<1x8x16xf32>,
    %98 = vector.extract_strided_slice %57 {offsets = [0, 180], sizes = [8, 16], strides = [1, 1]} : vector<8x286xf32> to vector<8x16xf32>
    %c0_80 = arith.constant 0 : index
    %c0_81 = arith.constant 0 : index
    %c160 = arith.constant 160 : index
    %99 = vector.load %arg4[%c0_80, %c0_81, %c160] : memref<1x8x256xf32, #tpu.memory_space<vmem>>, vector<1x8x16xf32>
    %100 = vector.shape_cast %99 : vector<1x8x16xf32> to vector<8x16xf32>
    %101 = vector.shape_cast %98 : vector<8x16xf32> to vector<1x8x16xf32>
    tpu.vector_store %arg4[%c0_80, %c0_81, %c160], %101 {strides = array<i32>} : memref<1x8x256xf32, #tpu.memory_space<vmem>>, vector<1x8x16xf32>,
    %102 = vector.extract_strided_slice %57 {offsets = [0, 198], sizes = [8, 16], strides = [1, 1]} : vector<8x286xf32> to vector<8x16xf32>
    %c0_82 = arith.constant 0 : index
    %c0_83 = arith.constant 0 : index
    %c176 = arith.constant 176 : index
    %103 = vector.load %arg4[%c0_82, %c0_83, %c176] : memref<1x8x256xf32, #tpu.memory_space<vmem>>, vector<1x8x16xf32>
    %104 = vector.shape_cast %103 : vector<1x8x16xf32> to vector<8x16xf32>
    %105 = vector.shape_cast %102 : vector<8x16xf32> to vector<1x8x16xf32>
    tpu.vector_store %arg4[%c0_82, %c0_83, %c176], %105 {strides = array<i32>} : memref<1x8x256xf32, #tpu.memory_space<vmem>>, vector<1x8x16xf32>,
    %106 = vector.extract_strided_slice %57 {offsets = [0, 216], sizes = [8, 16], strides = [1, 1]} : vector<8x286xf32> to vector<8x16xf32>
    %c0_84 = arith.constant 0 : index
    %c0_85 = arith.constant 0 : index
    %c192 = arith.constant 192 : index
    %107 = vector.load %arg4[%c0_84, %c0_85, %c192] : memref<1x8x256xf32, #tpu.memory_space<vmem>>, vector<1x8x16xf32>
    %108 = vector.shape_cast %107 : vector<1x8x16xf32> to vector<8x16xf32>
    %109 = vector.shape_cast %106 : vector<8x16xf32> to vector<1x8x16xf32>
    tpu.vector_store %arg4[%c0_84, %c0_85, %c192], %109 {strides = array<i32>} : memref<1x8x256xf32, #tpu.memory_space<vmem>>, vector<1x8x16xf32>,
    %110 = vector.extract_strided_slice %57 {offsets = [0, 234], sizes = [8, 16], strides = [1, 1]} : vector<8x286xf32> to vector<8x16xf32>
    %c0_86 = arith.constant 0 : index
    %c0_87 = arith.constant 0 : index
    %c208 = arith.constant 208 : index
    %111 = vector.load %arg4[%c0_86, %c0_87, %c208] : memref<1x8x256xf32, #tpu.memory_space<vmem>>, vector<1x8x16xf32>
    %112 = vector.shape_cast %111 : vector<1x8x16xf32> to vector<8x16xf32>
    %113 = vector.shape_cast %110 : vector<8x16xf32> to vector<1x8x16xf32>
    tpu.vector_store %arg4[%c0_86, %c0_87, %c208], %113 {strides = array<i32>} : memref<1x8x256xf32, #tpu.memory_space<vmem>>, vector<1x8x16xf32>,
    %114 = vector.extract_strided_slice %57 {offsets = [0, 252], sizes = [8, 16], strides = [1, 1]} : vector<8x286xf32> to vector<8x16xf32>
    %c0_88 = arith.constant 0 : index
    %c0_89 = arith.constant 0 : index
    %c224 = arith.constant 224 : index
    %115 = vector.load %arg4[%c0_88, %c0_89, %c224] : memref<1x8x256xf32, #tpu.memory_space<vmem>>, vector<1x8x16xf32>
    %116 = vector.shape_cast %115 : vector<1x8x16xf32> to vector<8x16xf32>
    %117 = vector.shape_cast %114 : vector<8x16xf32> to vector<1x8x16xf32>
    tpu.vector_store %arg4[%c0_88, %c0_89, %c224], %117 {strides = array<i32>} : memref<1x8x256xf32, #tpu.memory_space<vmem>>, vector<1x8x16xf32>,
    %118 = vector.extract_strided_slice %57 {offsets = [0, 270], sizes = [8, 16], strides = [1, 1]} : vector<8x286xf32> to vector<8x16xf32>
    %c0_90 = arith.constant 0 : index
    %c0_91 = arith.constant 0 : index
    %c240 = arith.constant 240 : index
    %119 = vector.load %arg4[%c0_90, %c0_91, %c240] : memref<1x8x256xf32, #tpu.memory_space<vmem>>, vector<1x8x16xf32>
    %120 = vector.shape_cast %119 : vector<1x8x16xf32> to vector<8x16xf32>
    %121 = vector.shape_cast %118 : vector<8x16xf32> to vector<1x8x16xf32>
    tpu.vector_store %arg4[%c0_90, %c0_91, %c240], %121 {strides = array<i32>} : memref<1x8x256xf32, #tpu.memory_space<vmem>>, vector<1x8x16xf32>,
    return
  }
  func.func @transform_0(%arg0: i32) -> (i32, i32, i32, i32) {
    %c0_i32 = arith.constant 0 : i32
    %c0_i32_0 = arith.constant 0 : i32
    %c0_i32_1 = arith.constant 0 : i32
    %c0_i32_2 = arith.constant 0 : i32
    return %arg0, %c0_i32, %c0_i32_0, %c0_i32_1 : i32, i32, i32, i32
  }
  func.func @transform_1(%arg0: i32) -> (i32, i32, i32) {
    %c0_i32 = arith.constant 0 : i32
    %c0_i32_0 = arith.constant 0 : i32
    %c0_i32_1 = arith.constant 0 : i32
    %c0_i32_2 = arith.constant 0 : i32
    return %c0_i32, %c0_i32_0, %c0_i32_1 : i32, i32, i32
  }
  func.func @transform_2(%arg0: i32) -> (i32, i32) {
    %c0_i32 = arith.constant 0 : i32
    %c0_i32_0 = arith.constant 0 : i32
    %c0_i32_1 = arith.constant 0 : i32
    return %c0_i32, %c0_i32_0 : i32, i32
  }
  func.func @transform_3(%arg0: i32) -> (i32, i32, i32) {
    %c0_i32 = arith.constant 0 : i32
    %c0_i32_0 = arith.constant 0 : i32
    %c0_i32_1 = arith.constant 0 : i32
    return %arg0, %c0_i32, %c0_i32_0 : i32, i32, i32
  }
}

</mosaic_0001>

<bundles_post_ra>
// kernel: basic_block.1
= control target key start
LH: loop header
LB: loop body
LE: loop exit
PB: predicated region body
PF: predicated region fallthrough
CT: control target
= control target key end

     0   :  { %s1624_s12 = smov 0   ;;  %s1847_s0 = inlined_call_operand.vmem [shape: bf16[2,1,4,324], index: 0, kind: input, shape index: {}]   ;;  %s1848_s1 = inlined_call_operand.vmem [shape: bf16[9,8,4], index: 1, kind: input, shape index: {}]   ;;  %s1849_s2 = inlined_call_operand.vmem [shape: f32[8,1], index: 2, kind: input, shape index: {}]   ;;  %s1850_s3 = inlined_call_operand.vmem [shape: f32[2,8,256], index: 3, kind: output, shape index: {}]  }
   0x1 LB: > { %s1412_s13 = sadd.s32 4294967295, %s1578_s12   ;;  %p1416_p0 = scmp.ge.s32.totalorder %s1578_s12, 1  ;;  %s1578_s12 = sphi %s1624_s12, %s13_s12  }
   0x2   : > { %p137_p1 = scmp.lt.s32.totalorder %s1578_s12, 3 }
   0x4   : > { %p138_p2 = pnand %p1416_p0, %p137_p1 }
   0x5   : > { %p161_p3 = scmp.lt.s32.totalorder (!%p138_p2), %s1412_s13, 1  ;;  %s1584_s18 = smov (!%p138_p2), 127  }
   0x6   : > { %141 = sbr.rel (%p138_p2) target bundleno = 556 (0x22c), region = 32  ;;  %s1585_s19 = smov (!%p138_p2), 126  }
   0x7   : > { %s1586_s20 = smov (!%p138_p2), 110   ;;  %s1587_s21 = smov (!%p138_p2), 109  }
   0x8   : > { %s1588_s22 = smov (!%p138_p2), 108   ;;  %s1589_s23 = smov (!%p138_p2), 92  }
   0x9   : > { %s1590_s24 = smov (!%p138_p2), 91   ;;  %s1591_s25 = smov (!%p138_p2), 90  }
   0xa   : > { %s1592_s28 = smov (!%p138_p2), 100   ;;  %s1594_s29 = smov (!%p138_p2), 124  }
   0xb   : > { %v181_v0 = vlaneseq  ;;  %v1580_v1 = vmov 1983009808   ;;  %v1581_v3 = vmov 0.0   ;;  %s1852_s13 = smov (!%p161_p3, %s1412_s13), 1  ;;  %vm1582_vm0 = vmmov 0   ;;  %v1265_v48 = vld [vmem:[%s1849_s2] sm:$0xff] }
   0xc   : > { %v179_v2 = vunpack.c.l.s4 %v1580_v1  ;;  %1476 = vmatprep.subr.bf16.mxu1 %v1581_v3  ;;  %1478 = vmatprep.mubr.msk.bf16.mxu1 %vm1582_vm0, %v1581_v3  ;;  %s1530_s14 = smul.u32 6, %s1852_s13  ;;  %v1583_v6 = vmov 0   ;;  %vm206_vm1 = vcmask 1041408   ;;  %vm199_vm2 = vcmask 1039360   ;;  %v1420_v53 = vld [vmem:[%s1848_s1 + $0x4] sm:$0xf] }
   0xd   : > { %v182_v4 = vshrl.u32 %v181_v0, 7  ;;  %248 = vmatprep.mubr.bf16.mxu0 %v1583_v6  ;;  %1563 = vset.pattern.permute.xlu0 %v1583_v6  ;;  %vm202_vm3 = vcmask 31744   ;;  %vm416_vm4 = vcmask 1031168   ;;  %v173_v63 = vld [vmem:[%s1848_s1] sm:$0xf]  ;;  %vm541_vm5 = vcmask 900096  }
   0xe   : > { %v180_v5 = vunpack.c.0.s8 %v179_v2  ;;  %s1645_s17 = scalar_lea.vmem %s1847_s0, %s1530_s14  ;;  %vm666_vm6 = vcmask 891904   ;;  %vm791_vm7 = vcmask 883712   ;;  %vm916_vm8 = vcmask 752640   ;;  %s1595_s30 = smov 122  }
   0xf   : > { %v172_v8 = vld [vmem:[%s1645_s17] sm:$0x3f]  ;;  %vm1041_vm9 = vcmask 744448   ;;  %vm1166_vm10 = vcmask 736256   ;;  %vm1277_vm11 = vcmask 130048   ;;  %s1596_s4 = smov 120  }
  0x10   : > { %v1640_v7 = vsub.s32 %v180_v5, %v182_v4  ;;  %v177_v10 = vcombine.high %v172_v8, %v172_v8  ;;  %v390_v11 = vld [vmem:[%s1645_s17] sm:$0x3f]  ;;  %s1597_s5 = smov 106   ;;  %s1598_s6 = smov 118   ;;  %vm1283_vm12 = vcmask 261248   ;;  %vm1288_vm13 = vcmask 392448  }
  0x11   : > { %v394_v15 = vcombine.high %v390_v11, %v390_v11  ;;  %v515_v17 = vld [vmem:[%s1645_s17] sm:$0x3f]  ;;  %s1600_s7 = smov 116   ;;  %s1601_s8 = smov 102   ;;  %vm1293_vm14 = vcmask 523648   ;;  %vm1298_vm15 = vcmask 654848  }
  0x12   : > { %v1649_v9 = vrot.slane %v172_v8, %v1640_v7  ;;  %v1654_v12 = vrot.slane %v177_v10, %v1640_v7  ;;  %v401_v14 = vrot.slane %v390_v11, %v1640_v7  ;;  %v526_v19 = vrot.slane %v515_v17, %v1640_v7  ;;  %v640_v22 = vld [vmem:[%s1645_s17] sm:$0x3f]  ;;  %v1427_v10 = vld [vmem:[%s1848_s1 + $0x8] sm:$0xf]  ;;  %s1602_s9 = smov 112  }
  0x13   : > { %v408_v18 = vrot.slane %v394_v15, %v1640_v7  ;;  %v519_v20 = vcombine.high %v515_v17, %v515_v17  ;;  %v651_v24 = vrot.slane %v640_v22, %v1640_v7  ;;  %v644_v25 = vcombine.high %v640_v22, %v640_v22  ;;  %v765_v27 = vld [vmem:[%s1645_s17] sm:$0x3f] }
  0x14   : > { %193 = vrot.lane.b32.xlu0 %v1649_v9, %s1584_s18  ;;  %v1658_v13 = vcombine.high %v1649_v9, %v1649_v9  ;;  %197 = vrot.lane.b32.xlu1 %v1654_v12, %s1584_s18  ;;  %v409_v16 = vcombine.high %v401_v14, %v401_v14  ;;  %v534_v21 = vcombine.high %v526_v19, %v526_v19  ;;  %v890_v32 = vld [vmem:[%s1645_s17] sm:$0x3f]  ;;  %v307_v56 = vsel %vm206_vm1, %v1654_v12, 0 }
  0x15   : > { %v533_v23 = vrot.slane %v519_v20, %v1640_v7  ;;  %v659_v26 = vcombine.high %v651_v24, %v651_v24  ;;  %v658_v28 = vrot.slane %v644_v25, %v1640_v7  ;;  %v776_v29 = vrot.slane %v765_v27, %v1640_v7  ;;  %v1015_v37 = vld [vmem:[%s1645_s17] sm:$0x3f] }
  0x16   : > { %v769_v30 = vcombine.high %v765_v27, %v765_v27  ;;  %v901_v34 = vrot.slane %v890_v32, %v1640_v7  ;;  %v894_v35 = vcombine.high %v890_v32, %v890_v32  ;;  %v1026_v39 = vrot.slane %v1015_v37, %v1640_v7  ;;  %v1140_v42 = vld [vmem:[%s1645_s17] sm:$0x3f]  ;;  %v1435_v27 = vld [vmem:[%s1848_s1 + $0x10] sm:$0xf] }
  0x17   : > { %v784_v31 = vcombine.high %v776_v29, %v776_v29  ;;  %v1019_v40 = vcombine.high %v1015_v37, %v1015_v37  ;;  %v1151_v44 = vrot.slane %v1140_v42, %v1640_v7  ;;  %v1144_v45 = vcombine.high %v1140_v42, %v1140_v42  ;;  %v1443_v42 = vld [vmem:[%s1848_s1 + $0x18] sm:$0xf] }
  0x18   : > { %195 = vrot.lane.b32.xlu0 %v1658_v13, %s1584_s18  ;;  %410 = vrot.lane.b32.xlu1 %v401_v14, %s1585_s19  ;;  %v783_v33 = vrot.slane %v769_v30, %v1640_v7  ;;  %v909_v36 = vcombine.high %v901_v34, %v901_v34  ;;  %v908_v38 = vrot.slane %v894_v35, %v1640_v7  ;;  %v301_v59 = vsel %vm206_vm1, %v1649_v9, 0  ;;  %v1439_v35 = vld [vmem:[%s1848_s1 + $0x14] sm:$0xf] }
  0x19   : > { %v1034_v41 = vcombine.high %v1026_v39, %v1026_v39  ;;  %v1033_v43 = vrot.slane %v1019_v40, %v1640_v7  ;;  %v1159_v46 = vcombine.high %v1151_v44, %v1151_v44  ;;  %v1158_v47 = vrot.slane %v1144_v45, %v1640_v7 }
  0x1c   : > { %412 = vrot.lane.b32.xlu0 %v409_v16, %s1585_s19  ;;  %414 = vrot.lane.b32.xlu1 %v408_v18, %s1585_s19 }
  0x20   : > { %535 = vrot.lane.b32.xlu0 %v526_v19, %s1586_s20  ;;  %537 = vrot.lane.b32.xlu1 %v534_v21, %s1586_s20  ;;  %v1431_v19 = vld [vmem:[%s1848_s1 + $0xc] sm:$0xf] }
  0x24   : > { %539 = vrot.lane.b32.xlu0 %v533_v23, %s1586_s20  ;;  %660 = vrot.lane.b32.xlu1 %v651_v24, %s1587_s21 }
  0x28   : > { %662 = vrot.lane.b32.xlu0 %v659_v26, %s1587_s21  ;;  %664 = vrot.lane.b32.xlu1 %v658_v28, %s1587_s21 }
  0x2c   : > { %785 = vrot.lane.b32.xlu0 %v776_v29, %s1588_s22  ;;  %787 = vrot.lane.b32.xlu1 %v784_v31, %s1588_s22 }
  0x30   : > { %789 = vrot.lane.b32.xlu0 %v783_v33, %s1588_s22  ;;  %910 = vrot.lane.b32.xlu1 %v901_v34, %s1589_s23 }
  0x34   : > { %912 = vrot.lane.b32.xlu0 %v909_v36, %s1589_s23  ;;  %914 = vrot.lane.b32.xlu1 %v908_v38, %s1589_s23 }
  0x38   : > { %1035 = vrot.lane.b32.xlu0 %v1026_v39, %s1590_s24  ;;  %1037 = vrot.lane.b32.xlu1 %v1034_v41, %s1590_s24 }
  0x3c   : > { %1039 = vrot.lane.b32.xlu0 %v1033_v43, %s1590_s24  ;;  %1160 = vrot.lane.b32.xlu1 %v1151_v44, %s1591_s25  ;;  %s1457_s24 = sshll.u32 %s1852_s13, 4  ;;  %s1593_s13 = smov 114  }
  0x3d   : > { %s1807_s27 = scalar_lea.vmem %s1850_s3, %s1457_s24 }
  0x40   : > { %1162 = vrot.lane.b32.xlu0 %v1159_v46, %s1591_s25  ;;  %1164 = vrot.lane.b32.xlu1 %v1158_v47, %s1591_s25 }
  0x44   : > { %1268 = vperm.xlu0 %1563, %v1265_v48  }
  0x86   : > { %v194_v49 = vpop.permute.xlu0 %193  ;;  %v198_v50 = vpop.permute.xlu1 %197 }
  0x87   : > { %v214_v51 = vsel %vm206_vm1, %v198_v50, 0 }
  0x88   : > { %1477 = vmatpush3.bf16.msra.mxu1 %v214_v51 }
  0x89   : > { %1482 = vmatprep.subr.bf16.mxu1 %v1581_v3 }
  0x8a   : > { %v196_v52 = vpop.permute.xlu0 %195  ;;  %v411_v58 = vpop.permute.xlu1 %410 }
  0x8b   : > { %v201_v54 = vsel %vm199_vm2, %v196_v52, %v198_v50  ;;  %v200_v55 = vsel %vm199_vm2, %v194_v49, %v196_v52  ;;  %1479 = vmatmul.mubr.msk.bf16.vlgmr.msra.gmra.mxu1 %vm202_vm3, %v1420_v53  ;;  %v1447_v49 = vld [vmem:[%s1848_s1 + $0x1c] sm:$0xf]  ;;  %vm1349_vm2 = vcmask 818176  }
  0x8c   : > { %1421 = vmatprep.subr.msk.bf16.mxu0 %vm206_vm1, %v201_v54  ;;  %v208_v57 = vsel %vm206_vm1, %v200_v55, 0  ;;  %1483 = vmatpush3.bf16.msra.mxu1 %v307_v56 }
  0x8d   : > { %231 = vmatpush1.bf16.msra.mxu0 %v208_v57  ;;  %1484 = vmatprep.mubr.msk.bf16.mxu1 %vm1582_vm0, %v1581_v3 }
  0x8e   : > { %1424 = vmatprep.subr.msk.bf16.mxu0 %vm206_vm1, %v1658_v13  ;;  %v413_v60 = vpop.permute.xlu0 %412  ;;  %1488 = vmatprep.subr.bf16.mxu1 %v1581_v3  ;;  %v415_v61 = vpop.permute.xlu1 %414 }
  0x8f   : > { %v418_v62 = vsel %vm416_vm4, %v413_v60, %v415_v61  ;;  %v417_v1 = vsel %vm416_vm4, %v411_v58, %v413_v60  ;;  %v429_v2 = vsel %vm206_vm1, %v415_v61, 0  ;;  %vm1315_vm4 = vcmask 932864  }
  0x90   : > { %1422 = vmatmul.mubr.msk.bf16.vlgmr.msra.gmra.mxu0 %vm202_vm3, %v1420_v53  ;;  %v423_v5 = vsel %vm206_vm1, %v417_v1, 0  ;;  %v1451_v53 = vld [vmem:[%s1848_s1 + $0x20] sm:$0xf] }
  0x91   : > { %324 = vmatpush1.bf16.msra.mxu0 %v301_v59  ;;  %341 = vmatprep.mubr.bf16.mxu0 %v1583_v6 }
  0x92   : > { %1428 = vmatprep.subr.msk.bf16.mxu0 %vm206_vm1, %v418_v62  ;;  %v536_v0 = vpop.permute.xlu0 %535  ;;  %v538_v4 = vpop.permute.xlu1 %537 }
  0x93   : > { %1485 = vmatmul.mubr.msk.bf16.vlgmr.msra.gmra.mxu1 %vm202_vm3, %v173_v63  ;;  %v542_v12 = vsel %vm541_vm5, %v536_v0, %v538_v4 }
  0x94   : > { %1489 = vmatpush3.bf16.msra.mxu1 %v429_v2  ;;  %1490 = vmatprep.mubr.msk.bf16.mxu1 %vm1582_vm0, %v1581_v3  ;;  %v548_v15 = vsel %vm206_vm1, %v542_v12, 0 }
  0x95   : > { %1494 = vmatprep.subr.bf16.mxu1 %v1581_v3 }
  0x96   : > { %v540_v7 = vpop.permute.xlu0 %539  ;;  %v661_v9 = vpop.permute.xlu1 %660 }
  0x97   : > { %v543_v8 = vsel %vm541_vm5, %v538_v4, %v540_v7  ;;  %v554_v13 = vsel %vm206_vm1, %v540_v7, 0 }
  0x98   : > { %1425 = vmatmul.mubr.msk.bf16.vlgmr.msra.gmra.mxu0 %vm202_vm3, %v173_v63 }
  0x99   : > { %446 = vmatpush1.bf16.msra.mxu0 %v423_v5  ;;  %463 = vmatprep.mubr.bf16.mxu0 %v1583_v6 }
  0x9a   : > { %1432 = vmatprep.subr.msk.bf16.mxu0 %vm206_vm1, %v543_v8  ;;  %v663_v11 = vpop.permute.xlu0 %662  ;;  %v665_v14 = vpop.permute.xlu1 %664 }
  0x9b   : > { %1491 = vmatmul.mubr.msk.bf16.vlgmr.msra.gmra.mxu1 %vm202_vm3, %v1427_v10  ;;  %v668_v17 = vsel %vm666_vm6, %v663_v11, %v665_v14  ;;  %v667_v20 = vsel %vm666_vm6, %v661_v9, %v663_v11  ;;  %v679_v21 = vsel %vm206_vm1, %v665_v14, 0 }
  0x9c   : > { %1495 = vmatpush3.bf16.msra.mxu1 %v554_v13  ;;  %1496 = vmatprep.mubr.msk.bf16.mxu1 %vm1582_vm0, %v1581_v3  ;;  %v673_v23 = vsel %vm206_vm1, %v667_v20, 0 }
  0x9d   : > { %1500 = vmatprep.subr.bf16.mxu1 %v1581_v3 }
  0x9e   : > { %v786_v16 = vpop.permute.xlu0 %785  ;;  %v788_v18 = vpop.permute.xlu1 %787 }
  0x9f   : > { %v792_v28 = vsel %vm791_vm7, %v786_v16, %v788_v18 }
  0xa0   : > { %1429 = vmatmul.mubr.msk.bf16.vlgmr.msra.gmra.mxu0 %vm202_vm3, %v1427_v10  ;;  %v798_v31 = vsel %vm206_vm1, %v792_v28, 0 }
  0xa1   : > { %571 = vmatpush1.bf16.msra.mxu0 %v548_v15  ;;  %588 = vmatprep.mubr.bf16.mxu0 %v1583_v6 }
  0xa2   : > { %1436 = vmatprep.subr.msk.bf16.mxu0 %vm206_vm1, %v668_v17  ;;  %v790_v22 = vpop.permute.xlu0 %789  ;;  %v911_v24 = vpop.permute.xlu1 %910 }
  0xa3   : > { %1497 = vmatmul.mubr.msk.bf16.vlgmr.msra.gmra.mxu1 %vm202_vm3, %v1431_v19  ;;  %v793_v25 = vsel %vm791_vm7, %v788_v18, %v790_v22  ;;  %v804_v29 = vsel %vm206_vm1, %v790_v22, 0 }
  0xa4   : > { %1501 = vmatpush3.bf16.msra.mxu1 %v679_v21  ;;  %1502 = vmatprep.mubr.msk.bf16.mxu1 %vm1582_vm0, %v1581_v3 }
  0xa5   : > { %1506 = vmatprep.subr.bf16.mxu1 %v1581_v3 }
  0xa6   : > { %v913_v26 = vpop.permute.xlu0 %912  ;;  %v915_v30 = vpop.permute.xlu1 %914 }
  0xa7   : > { %v918_v33 = vsel %vm916_vm8, %v913_v26, %v915_v30  ;;  %v917_v36 = vsel %vm916_vm8, %v911_v24, %v913_v26  ;;  %v929_v37 = vsel %vm206_vm1, %v915_v30, 0 }
  0xa8   : > { %1433 = vmatmul.mubr.msk.bf16.vlgmr.msra.gmra.mxu0 %vm202_vm3, %v1431_v19  ;;  %v923_v39 = vsel %vm206_vm1, %v917_v36, 0 }
  0xa9   : > { %696 = vmatpush1.bf16.msra.mxu0 %v673_v23  ;;  %713 = vmatprep.mubr.bf16.mxu0 %v1583_v6 }
  0xaa   : > { %1440 = vmatprep.subr.msk.bf16.mxu0 %vm206_vm1, %v793_v25  ;;  %v1036_v32 = vpop.permute.xlu0 %1035  ;;  %v1038_v34 = vpop.permute.xlu1 %1037 }
  0xab   : > { %1503 = vmatmul.mubr.msk.bf16.vlgmr.msra.gmra.mxu1 %vm202_vm3, %v1435_v27  ;;  %v1042_v43 = vsel %vm1041_vm9, %v1036_v32, %v1038_v34 }
  0xac   : > { %1507 = vmatpush3.bf16.msra.mxu1 %v804_v29  ;;  %1508 = vmatprep.mubr.msk.bf16.mxu1 %vm1582_vm0, %v1581_v3  ;;  %v1048_v47 = vsel %vm206_vm1, %v1042_v43, 0 }
  0xad   : > { %1512 = vmatprep.subr.bf16.mxu1 %v1581_v3 }
  0xae   : > { %v1040_v38 = vpop.permute.xlu0 %1039  ;;  %v1161_v40 = vpop.permute.xlu1 %1160 }
  0xaf   : > { %v1043_v41 = vsel %vm1041_vm9, %v1038_v34, %v1040_v38  ;;  %v1054_v44 = vsel %vm206_vm1, %v1040_v38, 0 }
  0xb0   : > { %1437 = vmatmul.mubr.msk.bf16.vlgmr.msra.gmra.mxu0 %vm202_vm3, %v1435_v27 }
  0xb1   : > { %821 = vmatpush1.bf16.msra.mxu0 %v798_v31  ;;  %838 = vmatprep.mubr.bf16.mxu0 %v1583_v6 }
  0xb2   : > { %1444 = vmatprep.subr.msk.bf16.mxu0 %vm206_vm1, %v918_v33  ;;  %v1163_v45 = vpop.permute.xlu0 %1162  ;;  %v1165_v46 = vpop.permute.xlu1 %1164 }
  0xb3   : > { %1509 = vmatmul.mubr.msk.bf16.vlgmr.msra.gmra.mxu1 %vm202_vm3, %v1439_v35  ;;  %v1168_v48 = vsel %vm1166_vm10, %v1163_v45, %v1165_v46  ;;  %v1167_v50 = vsel %vm1166_vm10, %v1161_v40, %v1163_v45  ;;  %v1179_v51 = vsel %vm206_vm1, %v1165_v46, 0 }
  0xb4   : > { %1513 = vmatpush3.bf16.msra.mxu1 %v929_v37  ;;  %1514 = vmatprep.mubr.msk.bf16.mxu1 %vm1582_vm0, %v1581_v3  ;;  %v1173_v52 = vsel %vm206_vm1, %v1167_v50, 0 }
  0xb5   : > { %1518 = vmatprep.subr.bf16.mxu1 %v1581_v3 }
  0xb8   : > { %1441 = vmatmul.mubr.msk.bf16.vlgmr.msra.gmra.mxu0 %vm202_vm3, %v1439_v35 }
  0xb9   : > { %946 = vmatpush1.bf16.msra.mxu0 %v923_v39  ;;  %963 = vmatprep.mubr.bf16.mxu0 %v1583_v6 }
  0xba   : > { %1448 = vmatprep.subr.msk.bf16.mxu0 %vm206_vm1, %v1043_v41 }
  0xbb   : > { %1515 = vmatmul.mubr.msk.bf16.vlgmr.msra.gmra.mxu1 %vm202_vm3, %v1443_v42 }
  0xbc   : > { %1519 = vmatpush3.bf16.msra.mxu1 %v1054_v44  ;;  %1520 = vmatprep.mubr.msk.bf16.mxu1 %vm1582_vm0, %v1581_v3 }
  0xbd   : > { %1524 = vmatprep.subr.bf16.mxu1 %v1581_v3 }
  0xc0   : > { %1445 = vmatmul.mubr.msk.bf16.vlgmr.msra.gmra.mxu0 %vm202_vm3, %v1443_v42 }
  0xc1   : > { %1071 = vmatpush1.bf16.msra.mxu0 %v1048_v47  ;;  %1088 = vmatprep.mubr.bf16.mxu0 %v1583_v6 }
  0xc2   : > { %1452 = vmatprep.subr.msk.bf16.mxu0 %vm206_vm1, %v1168_v48  ;;  %vm1308_vm1 = vcmask 917248  }
  0xc3   : > { %1521 = vmatmul.mubr.msk.bf16.vlgmr.msra.gmra.mxu1 %vm202_vm3, %v1447_v49 }
  0xc4   : > { %1525 = vmatpush3.bf16.msra.mxu1 %v1179_v51  ;;  %1526 = vmatprep.mubr.msk.bf16.mxu1 %vm1582_vm0, %v1581_v3  ;;  %vm1303_vm0 = vcmask 786048  }
  0xc8   : > { %1449 = vmatmul.mubr.msk.bf16.vlgmr.msra.gmra.mxu0 %vm202_vm3, %v1447_v49 }
  0xc9   : > { %1196 = vmatpush1.bf16.msra.mxu0 %v1173_v52  ;;  %1213 = vmatprep.mubr.bf16.mxu0 %v1583_v6 }
  0xcb   : > { %1527 = vmatmul.mubr.msk.bf16.vlgmr.msra.gmra.mxu1 %vm202_vm3, %v1451_v53 }
  0xd0   : > { %1453 = vmatmul.mubr.msk.bf16.vlgmr.msra.gmra.mxu0 %vm202_vm3, %v1451_v53  ;;  %vm1318_vm3 = vcmask 1048448  }
 0x14b   : > { %v291_v54 = vpop.f32.mrf.mxu1 }
 0x14d   : > { %v1480_v55 = vpop.f32.mrf.mxu1 }
 0x14f   : > { %v294_v57 = vpop.f32.mrf.mxu1 }
 0x150   : > { %v250_v56 = vpop.f32.mrf.mxu0 }
 0x151   : > { %v1481_v59 = vpop.f32.mrf.mxu1 }
 0x152   : > { %v252_v58 = vpop.f32.mrf.mxu0 }
 0x153   : > { %v384_v60 = vpop.f32.mrf.mxu1 }
 0x154   : > { %v254_v3 = vpop.f32.mrf.mxu0  ;;  %v385_v40 = vadd.f32 %v384_v60, %v291_v54 }
 0x155   : > { %v1486_v62 = vpop.f32.mrf.mxu1 }
 0x156   : > { %v255_v61 = vpop.f32.mrf.mxu0 }
 0x157   : > { %v387_v6 = vpop.f32.mrf.mxu1 }
 0x158   : > { %v343_v63 = vpop.f32.mrf.mxu0 }
 0x159   : > { %v1487_v1 = vpop.f32.mrf.mxu1  ;;  %v344_v45 = vadd.f32 %v343_v63, %v250_v56 }
 0x15a   : > { %v345_v0 = vpop.f32.mrf.mxu0 }
 0x15b   : > { %v506_v4 = vpop.f32.mrf.mxu1  ;;  %v346_v49 = vadd.f32 %v345_v0, %v252_v58 }
 0x15c   : > { %v347_v2 = vpop.f32.mrf.mxu0  ;;  %v514_v43 = vadd.f32 %v506_v4, %v385_v40 }
 0x15d   : > { %v1492_v7 = vpop.f32.mrf.mxu1 }
 0x15e   : > { %v348_v5 = vpop.f32.mrf.mxu0 }
 0x15f   : > { %v509_v9 = vpop.f32.mrf.mxu1 }
 0x160   : > { %v465_v8 = vpop.f32.mrf.mxu0 }
 0x161   : > { %v1493_v11 = vpop.f32.mrf.mxu1  ;;  %v512_v50 = vadd.f32 %v465_v8, %v344_v45  ;;  %v1269_v8 = vpop.permute.xlu0 %1268 }
 0x162   : > { %v467_v10 = vpop.f32.mrf.mxu0 }
 0x163   : > { %v631_v13 = vpop.f32.mrf.mxu1  ;;  %v513_v55 = vadd.f32 %v467_v10, %v346_v49 }
 0x164   : > { %v469_v12 = vpop.f32.mrf.mxu0  ;;  %v639_v47 = vadd.f32 %v631_v13, %v514_v43 }
 0x165   : > { %v1498_v15 = vpop.f32.mrf.mxu1 }
 0x166   : > { %v470_v14 = vpop.f32.mrf.mxu0 }
 0x167   : > { %v634_v17 = vpop.f32.mrf.mxu1 }
 0x168   : > { %v590_v16 = vpop.f32.mrf.mxu0 }
 0x169   : > { %v1499_v19 = vpop.f32.mrf.mxu1  ;;  %v637_v57 = vadd.f32 %v590_v16, %v512_v50 }
 0x16a   : > { %v592_v18 = vpop.f32.mrf.mxu0 }
 0x16b   : > { %v756_v21 = vpop.f32.mrf.mxu1  ;;  %v638_v62 = vadd.f32 %v592_v18, %v513_v55 }
 0x16c   : > { %v594_v20 = vpop.f32.mrf.mxu0  ;;  %v764_v52 = vadd.f32 %v756_v21, %v639_v47 }
 0x16d   : > { %v1504_v23 = vpop.f32.mrf.mxu1 }
 0x16e   : > { %v595_v22 = vpop.f32.mrf.mxu0 }
 0x16f   : > { %v759_v25 = vpop.f32.mrf.mxu1 }
 0x170   : > { %v715_v24 = vpop.f32.mrf.mxu0 }
 0x171   : > { %v1505_v27 = vpop.f32.mrf.mxu1  ;;  %v762_v54 = vadd.f32 %v715_v24, %v637_v57 }
 0x172   : > { %v717_v26 = vpop.f32.mrf.mxu0 }
 0x173   : > { %v881_v29 = vpop.f32.mrf.mxu1  ;;  %v763_v2 = vadd.f32 %v717_v26, %v638_v62 }
 0x174   : > { %v719_v28 = vpop.f32.mrf.mxu0  ;;  %v889_v3 = vadd.f32 %v881_v29, %v764_v52 }
 0x175   : > { %v1510_v31 = vpop.f32.mrf.mxu1 }
 0x176   : > { %v720_v30 = vpop.f32.mrf.mxu0 }
 0x177   : > { %v884_v33 = vpop.f32.mrf.mxu1 }
 0x178   : > { %v840_v32 = vpop.f32.mrf.mxu0 }
 0x179   : > { %v1511_v35 = vpop.f32.mrf.mxu1  ;;  %v887_v56 = vadd.f32 %v840_v32, %v762_v54 }
 0x17a   : > { %v842_v34 = vpop.f32.mrf.mxu0 }
 0x17b   : > { %v1006_v37 = vpop.f32.mrf.mxu1  ;;  %v888_v0 = vadd.f32 %v842_v34, %v763_v2 }
 0x17c   : > { %v844_v36 = vpop.f32.mrf.mxu0  ;;  %v1014_v6 = vadd.f32 %v1006_v37, %v889_v3 }
 0x17d   : > { %v1516_v39 = vpop.f32.mrf.mxu1 }
 0x17e   : > { %v845_v38 = vpop.f32.mrf.mxu0 }
 0x17f   : > { %v1009_v42 = vpop.f32.mrf.mxu1 }
 0x180   : > { %v965_v41 = vpop.f32.mrf.mxu0 }
 0x181   : > { %v1517_v46 = vpop.f32.mrf.mxu1  ;;  %v1012_v5 = vadd.f32 %v965_v41, %v887_v56 }
 0x182   : > { %v967_v44 = vpop.f32.mrf.mxu0 }
 0x183   : > { %v1131_v51 = vpop.f32.mrf.mxu1  ;;  %v1013_v11 = vadd.f32 %v967_v44, %v888_v0 }
 0x184   : > { %v969_v48 = vpop.f32.mrf.mxu0  ;;  %v1139_v4 = vadd.f32 %v1131_v51, %v1014_v6 }
 0x185   : > { %v1522_v59 = vpop.f32.mrf.mxu1 }
 0x186   : > { %v970_v53 = vpop.f32.mrf.mxu0 }
 0x187   : > { %v1134_v60 = vpop.f32.mrf.mxu1 }
 0x188   : > { %v1090_v61 = vpop.f32.mrf.mxu0 }
 0x189   : > { %v1523_v63 = vpop.f32.mrf.mxu1  ;;  %v1137_v12 = vadd.f32 %v1090_v61, %v1012_v5 }
 0x18a   : > { %v1092_v1 = vpop.f32.mrf.mxu0 }
 0x18b   : > { %v1256_v7 = vpop.f32.mrf.mxu1  ;;  %v1138_v16 = vadd.f32 %v1092_v1, %v1013_v11 }
 0x18c   : > { %v1094_v58 = vpop.f32.mrf.mxu0  ;;  %v1264_v9 = vadd.f32 %v1256_v7, %v1139_v4 }
 0x18d   : > { %v1528_v13 = vpop.f32.mrf.mxu1 }
 0x18e   : > { %v1095_v10 = vpop.f32.mrf.mxu0  ;;  %v1273_v14 = vadd.f32 %v1269_v8, %v1264_v9 }
 0x18f   : > { %v1259_v18 = vpop.f32.mrf.mxu1 }
 0x190   : > { %v1215_v15 = vpop.f32.mrf.mxu0  ;;  %v1276_v20 = vmax.f32 %v1273_v14, 0.0 }
 0x191   : > { %v1262_v17 = vadd.f32 %v1215_v15, %v1137_v12  ;;  %v1529_v23 = vpop.f32.mrf.mxu1 }
 0x192   : > { %v1217_v19 = vpop.f32.mrf.mxu0  ;;  %1347 = vrot.lane.b32.xlu0 %v1276_v20, %s1592_s28 }
 0x193   : > { %v1271_v21 = vadd.f32 %v1269_v8, %v1262_v17  ;;  %v1263_v22 = vadd.f32 %v1217_v19, %v1138_v16 }
 0x194   : > { %v1219_v24 = vpop.f32.mrf.mxu0 }
 0x195   : > { %v1274_v25 = vmax.f32 %v1271_v21, 0.0  ;;  %v1272_v26 = vadd.f32 %v1269_v8, %v1263_v22 }
 0x196   : > { %v1220_v27 = vpop.f32.mrf.mxu0 }
 0x197   : > { %1280 = vrot.lane.b32.xlu1 %v1274_v25, %s1585_s19  ;;  %1278 = vst.msk [vmem:[%s1807_s27] sm:$0xff] %vm1277_vm11, %v1274_v25  ;;  %1311 = vrot.lane.b32.xlu0 %v1274_v25, %s1593_s13  ;;  %v1275_v28 = vmax.f32 %v1272_v26, 0.0  ;;  %s1599_s19 = smov 104  }
 0x19b   : > { %1285 = vrot.lane.b32.xlu1 %v1274_v25, %s1594_s29  ;;  %1324 = vrot.lane.b32.xlu0 %v1275_v28, %s1586_s20  ;;  %s1603_s20 = smov 98  }
 0x19f   : > { %1290 = vrot.lane.b32.xlu1 %v1274_v25, %s1595_s30  ;;  %1328 = vrot.lane.b32.xlu0 %v1275_v28, %s1588_s22 }
 0x1a3   : > { %1295 = vrot.lane.b32.xlu1 %v1274_v25, %s1596_s4  ;;  %1332 = vrot.lane.b32.xlu0 %v1275_v28, %s1597_s5 }
 0x1a7   : > { %1300 = vrot.lane.b32.xlu1 %v1274_v25, %s1598_s6  ;;  %1336 = vrot.lane.b32.xlu0 %v1275_v28, %s1599_s19 }
 0x1ab   : > { %1305 = vrot.lane.b32.xlu1 %v1274_v25, %s1600_s7  ;;  %1340 = vrot.lane.b32.xlu0 %v1275_v28, %s1601_s8 }
 0x1af   : > { %1320 = vrot.lane.b32.xlu1 %v1275_v28, %s1602_s9  ;;  %1353 = vrot.lane.b32.xlu0 %v1276_v20, %s1603_s20 }
 0x1b3   : > { %1345 = vrot.lane.b32.xlu1 %v1275_v28, %s1592_s28 }
 0x1b7   : > { %1313 = vrot.lane.b32.xlu1 %v1275_v28, %s1593_s13 }
 0x204   : > { %v1348_v29 = vpop.permute.xlu0 %1347 }
 0x209   : > { %v1281_v30 = vpop.permute.xlu1 %1280  ;;  %v1312_v31 = vpop.permute.xlu0 %1311 }
 0x20a   : > { %1284 = vst.msk [vmem:[%s1807_s27] sm:$0xff] %vm1283_vm12, %v1281_v30 }
 0x20d   : > { %v1286_v32 = vpop.permute.xlu1 %1285  ;;  %v1325_v33 = vpop.permute.xlu0 %1324 }
 0x20e   : > { %1289 = vst.msk [vmem:[%s1807_s27] sm:$0xff] %vm1288_vm13, %v1286_v32 }
 0x211   : > { %v1291_v34 = vpop.permute.xlu1 %1290  ;;  %v1329_v35 = vpop.permute.xlu0 %1328 }
 0x212   : > { %1294 = vst.msk [vmem:[%s1807_s27] sm:$0xff] %vm1293_vm14, %v1291_v34 }
 0x215   : > { %v1296_v36 = vpop.permute.xlu1 %1295  ;;  %v1333_v37 = vpop.permute.xlu0 %1332 }
 0x216   : > { %1299 = vst.msk [vmem:[%s1807_s27] sm:$0xff] %vm1298_vm15, %v1296_v36 }
 0x219   : > { %v1301_v38 = vpop.permute.xlu1 %1300  ;;  %v1337_v39 = vpop.permute.xlu0 %1336 }
 0x21a   : > { %1304 = vst.msk [vmem:[%s1807_s27] sm:$0xff] %vm1303_vm0, %v1301_v38 }
 0x21d   : > { %v1306_v40 = vpop.permute.xlu1 %1305  ;;  %v1341_v42 = vpop.permute.xlu0 %1340 }
 0x21e   : > { %1309 = vst.msk [vmem:[%s1807_s27] sm:$0xff] %vm1308_vm1, %v1306_v40 }
 0x221   : > { %v1321_v41 = vpop.permute.xlu1 %1320  ;;  %v1354_v45 = vpop.permute.xlu0 %1353 }
 0x222   : > { %1323 = vst.msk [vmem:[%s1807_s27 + $0x8] sm:$0xff] %vm1277_vm11, %v1321_v41 }
 0x223   : > { %1327 = vst.msk [vmem:[%s1807_s27 + $0x8] sm:$0xff] %vm1283_vm12, %v1325_v33 }
 0x224   : > { %1331 = vst.msk [vmem:[%s1807_s27 + $0x8] sm:$0xff] %vm1288_vm13, %v1329_v35 }
 0x225   : > { %1335 = vst.msk [vmem:[%s1807_s27 + $0x8] sm:$0xff] %vm1293_vm14, %v1333_v37  ;;  %v1346_v43 = vpop.permute.xlu1 %1345 }
 0x226   : > { %1339 = vst.msk [vmem:[%s1807_s27 + $0x8] sm:$0xff] %vm1298_vm15, %v1337_v39  ;;  %v1350_v44 = vsel %vm1349_vm2, %v1346_v43, %v1348_v29 }
 0x227   : > { %1343 = vst.msk [vmem:[%s1807_s27 + $0x8] sm:$0xff] %vm1303_vm0, %v1341_v42 }
 0x228   : > { %1352 = vst.msk [vmem:[%s1807_s27 + $0x8] sm:$0xff] %vm1308_vm1, %v1350_v44 }
 0x229   : > { %1356 = vst.msk [vmem:[%s1807_s27 + $0x8] sm:$0xff] %vm1318_vm3, %v1354_v45  ;;  %v1314_v46 = vpop.permute.xlu1 %1313 }
 0x22a   : > { %v1316_v47 = vsel %vm1315_vm4, %v1312_v31, %v1314_v46 }
 0x22b   : > { %1319 = vst.msk [vmem:[%s1807_s27] sm:$0xff] %vm1318_vm3, %v1316_v47 }
 0x22c PF: > { %s13_s12 = sadd.s32 1, %s1578_s12  }
 0x22d   : > { %p10_p4 = scmp.ge.s32.totalorder %s13_s12, 4  }
 0x22f   :  { %12 = sbr.rel (!%p10_p4) target bundleno = 1 (0x1), region = 70 }

</bundles_post_ra>
